<compile_context>
chip_gen: v5e
topology: v5e:2x2
jax: 0.10.0
libtpu: 0.0.40
codegen_flags: <defaults>
</compile_context>

<pallas_src>
import functools
import math

import jax
import jax.numpy as jnp
from jax.experimental import pallas as pl
from jax.experimental.pallas import tpu as pltpu


def _self_attention_kernel(x_ref, wt_ref, b_ref, o_ref, *,
                           hidden_size, matmul_dtype, approx_reciprocal):
    bt, s, hp = x_ref.shape

    x = x_ref[...]                            # (Bt, S, Hp), input dtype
    wt = wt_ref[...].astype(matmul_dtype)     # (Hp, Hp), already W^T
    b = b_ref[...].astype(jnp.float32)        # (1, Hp)

    # Q = K = V = x @ W^T + b  -- single 2-D matmul with M = Bt*S for MXU fill.
    x2 = x.astype(matmul_dtype).reshape(bt * s, hp)
    q = jnp.dot(x2, wt, preferred_element_type=jnp.float32)
    q = q.reshape(bt, s, hp) + b              # (Bt, S, Hp) f32

    # scores = (Q * 1/sqrt(H)) @ K^T  -- scale folded into the (S,H) operand.
    inv_sqrt_h = 1.0 / math.sqrt(hidden_size)
    qm = q.astype(matmul_dtype)
    q_scaled = (q * inv_sqrt_h).astype(matmul_dtype)
    scores = jnp.einsum("bsh,bth->bst", q_scaled, qm,
                        preferred_element_type=jnp.float32)

    # Numerically-stable softmax along the last axis (f32 math).
    scores = scores - jnp.max(scores, axis=-1, keepdims=True)
    p = jnp.exp(scores)
    denom = jnp.sum(p, axis=-1, keepdims=True)
    p = p * pl.reciprocal(denom, approx=approx_reciprocal)

    # out = probs @ V
    out = jnp.einsum("bst,bth->bsh", p.astype(matmul_dtype), qm,
                     preferred_element_type=jnp.float32)
    o_ref[...] = out.astype(o_ref.dtype)


def _round_up(x, m):
    return (x + m - 1) // m * m


def _pick_batch_tile(B, S, Hp, itemsize, budget_bytes=24 << 20):
    """Largest divisor of B whose per-step working set fits the VMEM budget."""
    for bt in range(B, 0, -1):
        if B % bt:
            continue
        io_blocks = 2 * 2 * bt * S * Hp * itemsize            # x + out, double-buffered
        temporaries = 6 * bt * S * Hp * 4 + 3 * bt * S * S * 4
        if io_blocks + temporaries <= budget_bytes:
            return bt
    return 1


def self_attention(particles, weight, bias, *,
                   matmul_dtype=jnp.bfloat16, approx_reciprocal=True,
                   batch_tile=None):
    """particles: (B, S, H); weight (H, H) / bias (H,) of the `query` nn.Linear
    (y = x @ W^T + b). Returns (B, S, H)."""
    B, S, H = particles.shape
    Hp = _round_up(H, 128)          # lane-dense hidden dim
    pad = Hp - H

    # Pre-transpose W on the host and zero-pad to the lane-dense width. Padded
    # columns of q stay exactly 0, so scores / softmax / output are unchanged.
    w_t = jnp.swapaxes(weight, 0, 1).astype(matmul_dtype)
    if pad:
        particles_p = jnp.pad(particles, ((0, 0), (0, 0), (0, pad)))
        w_t = jnp.pad(w_t, ((0, pad), (0, pad)))
        bias_p = jnp.pad(bias, (0, pad))
    else:
        particles_p = particles
        bias_p = bias
    bias2d = bias_p.reshape(1, Hp).astype(jnp.float32)

    itemsize = jnp.dtype(particles.dtype).itemsize
    Bt = batch_tile if batch_tile is not None else _pick_batch_tile(B, S, Hp, itemsize)
    assert B % Bt == 0, (B, Bt)

    # Scoped-VMEM limit sized from the actual blocks, with generous headroom.
    w_bytes = Hp * Hp * jnp.dtype(matmul_dtype).itemsize
    need = (2 * 2 * Bt * S * Hp * itemsize          # x + out, double-buffered
            + 2 * (w_bytes + Hp * 4)                # weight + bias
            + 6 * Bt * S * Hp * 4 + 3 * Bt * S * S * 4)   # in-kernel temporaries
    vmem_limit = int(min(max(2 * need, 16 << 20), 64 << 20))

    kernel = functools.partial(
        _self_attention_kernel,
        hidden_size=H,                       # scale uses the *unpadded* H
        matmul_dtype=matmul_dtype,
        approx_reciprocal=approx_reciprocal)

    out_p = pl.pallas_call(
        kernel,
        out_shape=jax.ShapeDtypeStruct((B, S, Hp), particles.dtype),
        grid_spec=pltpu.PrefetchScalarGridSpec(
            num_scalar_prefetch=0,
            grid=(B // Bt,),
            in_specs=[
                # Bt batch elements per grid step.
                pl.BlockSpec((Bt, S, Hp), lambda i: (i, 0, 0)),
                # Constant weight/bias blocks (same tile every step; could be
                # single-buffered via pipeline_mode=pl.Buffered(1) for huge H).
                pl.BlockSpec((Hp, Hp), lambda i: (0, 0)),
                pl.BlockSpec((1, Hp), lambda i: (0, 0)),
            ],
            out_specs=pl.BlockSpec((Bt, S, Hp), lambda i: (i, 0, 0)),
        ),
        compiler_params=pltpu.CompilerParams(
            dimension_semantics=("parallel",),   # megacore-shardable batch axis
            vmem_limit_bytes=vmem_limit,
        ),
    )(particles_p, w_t, bias2d)

    return out_p[:, :, :H] if pad else out_p


def self_attention_ref(particles, weight, bias):
    """Pure-JAX reference mirroring the PyTorch forward exactly."""
    H = particles.shape[-1]
    q = jnp.einsum("bsh,oh->bso", particles, weight) + bias
    scores = jnp.einsum("bsh,bth->bst", q, q) / math.sqrt(H)
    probs = jax.nn.softmax(scores, axis=-1)
    return jnp.einsum("bst,bth->bsh", probs, q)


if __name__ == "__main__":
    B, S, H = 2, 8, 32  # batch, seq, hidden_size

    key = jax.random.PRNGKey(0)
    k_x, k_w, k_b = jax.random.split(key, 3)

    particles = jax.random.normal(k_x, (B, S, H), dtype=jnp.float32)
    bound = 1.0 / math.sqrt(H)
    weight = jax.random.uniform(k_w, (H, H), jnp.float32, -bound, bound)
    bias = jax.random.uniform(k_b, (H,), jnp.float32, -bound, bound)

    ref = self_attention_ref(particles, weight, bias)

    # Exact-precision path: f32 MXU operands + exact reciprocal, tight check.
    out_exact = jax.block_until_ready(
        self_attention(particles, weight, bias,
                       matmul_dtype=jnp.float32, approx_reciprocal=False))
    assert out_exact.shape == (B, S, H), out_exact.shape
    assert jnp.allclose(out_exact, ref, atol=1e-5, rtol=1e-5), (
        float(jnp.max(jnp.abs(out_exact - ref))))

    # Fast default path: bf16 MXU operands + approximate EUP reciprocal.
    out_fast = jax.block_until_ready(self_attention(particles, weight, bias))
    assert out_fast.shape == (B, S, H), out_fast.shape
    assert jnp.allclose(out_fast, ref, atol=5e-2, rtol=5e-2), (
        float(jnp.max(jnp.abs(out_fast - ref))))

    print("KERNEL_OK")
</pallas_src>

<mosaic_0001>
module attributes {stable_mosaic.version = 11 : i64} {
  func.func @_self_attention_kernel(%arg0: i32, %arg1: memref<2x8x128xf32, #tpu.memory_space<vmem>>, %arg2: memref<128x128xf32, #tpu.memory_space<vmem>>, %arg3: memref<1x128xf32, #tpu.memory_space<vmem>>, %arg4: memref<2x8x128xf32, #tpu.memory_space<vmem>>) attributes {dimension_semantics = [#tpu.dimension_semantics<parallel>], iteration_bounds = array<i64: 1>, scalar_prefetch = 0 : i64, scratch_operands = 0 : i64, tpu.core_type = #tpu.core_type<tc>, window_params = [{transform_indices = @transform_0, window_bounds = array<i64: 2, 8, 128>}, {pipeline_mode = #tpu.pipeline_mode<synchronous>, transform_indices = @transform_1, window_bounds = array<i64: 128, 128>}, {pipeline_mode = #tpu.pipeline_mode<synchronous>, transform_indices = @transform_2, window_bounds = array<i64: 1, 128>}, {transform_indices = @transform_3, window_bounds = array<i64: 2, 8, 128>}]} {
    %c0 = arith.constant 0 : index
    %c0_0 = arith.constant 0 : index
    %c0_1 = arith.constant 0 : index
    %0 = vector.load %arg1[%c0, %c0_0, %c0_1] : memref<2x8x128xf32, #tpu.memory_space<vmem>>, vector<2x8x128xf32>
    %c0_2 = arith.constant 0 : index
    %c0_3 = arith.constant 0 : index
    %1 = vector.load %arg2[%c0_2, %c0_3] : memref<128x128xf32, #tpu.memory_space<vmem>>, vector<128x128xf32>
    %c0_4 = arith.constant 0 : index
    %c0_5 = arith.constant 0 : index
    %2 = vector.load %arg3[%c0_4, %c0_5] : memref<1x128xf32, #tpu.memory_space<vmem>>, vector<1x128xf32>
    %3 = vector.shape_cast %0 : vector<2x8x128xf32> to vector<16x128xf32>
    %cst = arith.constant dense<0.000000e+00> : vector<16x128xf32>
    %4 = tpu.matmul %3, %1, %cst {dimension_numbers = #tpu.dot_dimension_numbers<[1], [0], [0], [1], [0, 0, 1, 1], [], []>} : vector<16x128xf32>, vector<128x128xf32>, vector<16x128xf32> -> vector<16x128xf32>
    %5 = vector.shape_cast %4 : vector<16x128xf32> to vector<2x8x128xf32>
    %6 = vector.shape_cast %2 : vector<1x128xf32> to vector<1x1x128xf32>
    %7 = vector.broadcast %6 : vector<1x1x128xf32> to vector<2x8x128xf32>
    %8 = arith.addf %5, %7 : vector<2x8x128xf32>
    %cst_6 = arith.constant 0.176776692 : f32
    %9 = vector.broadcast %cst_6 : f32 to vector<2x8x128xf32>
    %10 = arith.mulf %8, %9 : vector<2x8x128xf32>
    "tpu.trace_start"() <{level = 10 : i32, message = "bsh,bth->bst"}> : () -> ()
    %cst_7 = arith.constant dense<0.000000e+00> : vector<2x8x8xf32>
    %11 = tpu.matmul %10, %8, %cst_7 {dimension_numbers = #tpu.dot_dimension_numbers<[2], [2], [1], [1], [0, 0, 0, 1, 1, 1], [0], [0]>} : vector<2x8x128xf32>, vector<2x8x128xf32>, vector<2x8x8xf32> -> vector<2x8x8xf32>
    "tpu.trace_stop"() : () -> ()
    %cst_8 = arith.constant dense<0xFF800000> : vector<2x8xf32>
    %12 = vector.multi_reduction <maximumf>, %11, %cst_8 [2] : vector<2x8x8xf32> to vector<2x8xf32>
    %13 = vector.shape_cast %12 : vector<2x8xf32> to vector<2x8x1xf32>
    %14 = vector.broadcast %13 : vector<2x8x1xf32> to vector<2x8x8xf32>
    %15 = arith.subf %11, %14 : vector<2x8x8xf32>
    %16 = math.exp %15 : vector<2x8x8xf32>
    %cst_9 = arith.constant dense<0.000000e+00> : vector<2x8xf32>
    %17 = vector.multi_reduction <add>, %16, %cst_9 [2] : vector<2x8x8xf32> to vector<2x8xf32>
    %18 = vector.shape_cast %17 : vector<2x8xf32> to vector<2x8x1xf32>
    %19 = tpu.reciprocal %18 : vector<2x8x1xf32> -> vector<2x8x1xf32>
    %20 = vector.broadcast %19 : vector<2x8x1xf32> to vector<2x8x8xf32>
    %21 = arith.mulf %16, %20 : vector<2x8x8xf32>
    "tpu.trace_start"() <{level = 10 : i32, message = "bst,bth->bsh"}> : () -> ()
    %cst_10 = arith.constant dense<0.000000e+00> : vector<2x8x128xf32>
    %22 = tpu.matmul %21, %8, %cst_10 {dimension_numbers = #tpu.dot_dimension_numbers<[2], [1], [1], [2], [0, 0, 0, 1, 1, 2], [0], [0]>} : vector<2x8x8xf32>, vector<2x8x128xf32>, vector<2x8x128xf32> -> vector<2x8x128xf32>
    "tpu.trace_stop"() : () -> ()
    %c0_11 = arith.constant 0 : index
    %c0_12 = arith.constant 0 : index
    %c0_13 = arith.constant 0 : index
    %23 = vector.load %arg4[%c0_11, %c0_12, %c0_13] : memref<2x8x128xf32, #tpu.memory_space<vmem>>, vector<2x8x128xf32>
    tpu.vector_store %arg4[%c0_11, %c0_12, %c0_13], %22 {strides = array<i32>} : memref<2x8x128xf32, #tpu.memory_space<vmem>>, vector<2x8x128xf32>,
    return
  }
  func.func @transform_0(%arg0: i32) -> (i32, i32, i32) {
    %c0_i32 = arith.constant 0 : i32
    %c0_i32_0 = arith.constant 0 : i32
    %c0_i32_1 = arith.constant 0 : i32
    return %arg0, %c0_i32, %c0_i32_0 : i32, i32, i32
  }
  func.func @transform_1(%arg0: i32) -> (i32, i32) {
    %c0_i32 = arith.constant 0 : i32
    %c0_i32_0 = arith.constant 0 : i32
    %c0_i32_1 = arith.constant 0 : i32
    return %c0_i32, %c0_i32_0 : i32, i32
  }
  func.func @transform_2(%arg0: i32) -> (i32, i32) {
    %c0_i32 = arith.constant 0 : i32
    %c0_i32_0 = arith.constant 0 : i32
    %c0_i32_1 = arith.constant 0 : i32
    return %c0_i32, %c0_i32_0 : i32, i32
  }
  func.func @transform_3(%arg0: i32) -> (i32, i32, i32) {
    %c0_i32 = arith.constant 0 : i32
    %c0_i32_0 = arith.constant 0 : i32
    %c0_i32_1 = arith.constant 0 : i32
    return %arg0, %c0_i32, %c0_i32_0 : i32, i32, i32
  }
}

</mosaic_0001>

<bundles_post_ra>
// kernel: tpu_custom_call.1
= control target key start
LH: loop header
LB: loop body
LE: loop exit
PB: predicated region body
PF: predicated region fallthrough
CT: control target
= control target key end

     0   :  { %8 = vsyncpa [#allocation3], 0  ;;  %s399_s0 = inlined_call_operand.hbm [shape: f32[2,8,128], index: 0, kind: input, shape index: {}]   ;;  %s400_s1 = inlined_call_operand.hbm [shape: f32[128,128], index: 1, kind: input, shape index: {}]   ;;  %s401_s2 = inlined_call_operand.vmem [shape: f32[1,128], index: 2, kind: input, shape index: {}]   ;;  %s402_s3 = inlined_call_operand.hbm [shape: f32[2,8,128], index: 3, kind: output, shape index: {}]  }
   0x1   :  { %9 = vsyncpa [#allocation6], 0 }
   0x2   :  { %10 = vsyncpa [#allocation4], 0  ;;  %s15_s14 = sshll.u32 %s399_s0, 4  ;;  %s347_s15 = smov [#allocation2]   ;;  %s16_s14 = int_to_ptr.hbm [resolvable:$true] %s15_s14 }
   0x3   :  { %s17_s16 = sshll.u32 %s347_s15, 4  ;;  %s28_s19 = sshll.u32 %s400_s1, 4  ;;  %s18_s16 = int_to_ptr.vmem [resolvable:$true] %s17_s16  ;;  %s29_s19 = int_to_ptr.hbm [resolvable:$true] %s28_s19 }
   0x4   :  { %s348_s20 = smov 128   ;;  %s349_s21 = smov 8  }
   0x5   :  { %23 = dma.hbm_to_vmem [thread:$0]  %s16_s14, 256, %s18_s16, [#allocation3], %s348_s20, %s348_s20, %s349_s21  }
   0x6   :  { %s350_s22 = smov [#allocation5]  }
   0x7   :  { %s30_s23 = sshll.u32 %s350_s22, 4  ;;  %s31_s23 = int_to_ptr.vmem [resolvable:$true] %s30_s23 }
   0x8   :  { %36 = dma.hbm_to_vmem [thread:$0]  %s29_s19, 2048, %s31_s23, [#allocation6], %s348_s20, %s348_s20, %s349_s21  }
   0x9   :  { %341 = dma.done.wait [#allocation3], 256  }
   0xa   :  { %342 = vsyncadd [#allocation3], 4294967040 }
   0xb   :  { %343 = dma.done.wait [#allocation6], 2048  }
   0xc   :  { %344 = vsyncadd [#allocation6], 4294965248  ;;  %v64_v0 = vld [vmem:[#allocation5 + $0x78] sm:$0xff]  ;;  %v63_v1 = vld [vmem:[#allocation5 + $0x70] sm:$0xff]  ;;  %vm136_vm0 = vcmask 64512   ;;  %s239_s27 = sshll.u32 %s402_s3, 4  ;;  %s240_s27 = int_to_ptr.hbm [resolvable:$true] %s239_s27 }
   0xd   :  { %66 = vmatpush.msra.mxu0 %v64_v0  ;;  %v62_v2 = vld [vmem:[#allocation5 + $0x68] sm:$0xff]  ;;  %v61_v3 = vld [vmem:[#allocation5 + $0x60] sm:$0xff]  ;;  %v60_v4 = vld [vmem:[#allocation5 + $0x58] sm:$0xff] }
   0xe   :  { %v59_v5 = vld [vmem:[#allocation5 + $0x50] sm:$0xff]  ;;  %v58_v6 = vld [vmem:[#allocation5 + $0x48] sm:$0xff]  ;;  %v57_v7 = vld [vmem:[#allocation5 + $0x40] sm:$0xff] }
   0xf   :  { %67 = vmatpush.msra.mxu0 %v63_v1  ;;  %v56_v8 = vld [vmem:[#allocation5 + $0x38] sm:$0xff]  ;;  %v55_v9 = vld [vmem:[#allocation5 + $0x30] sm:$0xff]  ;;  %v54_v10 = vld [vmem:[#allocation5 + $0x28] sm:$0xff] }
  0x10   :  { %v53_v11 = vld [vmem:[#allocation5 + $0x20] sm:$0xff]  ;;  %v52_v12 = vld [vmem:[#allocation5 + $0x18] sm:$0xff]  ;;  %v51_v13 = vld [vmem:[#allocation5 + $0x10] sm:$0xff] }
  0x11   :  { %68 = vmatpush.msra.mxu0 %v62_v2  ;;  %v50_v14 = vld [vmem:[#allocation5 + $0x8] sm:$0xff]  ;;  %v49_v15 = vld [vmem:[#allocation5] sm:$0xff]  ;;  %v47_v16 = vld [vmem:[#allocation2] sm:$0xff] }
  0x12   :  { %v48_v17 = vld [vmem:[#allocation2 + $0x8] sm:$0xff]  ;;  %v260_v18 = vld [vmem:[%s401_s2] ss:$0 sm:$0xff]  ;;  %s351_s2 = smov [#allocation7]  }
  0x13   :  { %69 = vmatpush.msra.mxu0 %v61_v3  ;;  %s237_s24 = sshll.u32 %s351_s2, 4  ;;  %s238_s24 = int_to_ptr.vmem [resolvable:$true] %s237_s24 }
  0x15   :  { %70 = vmatpush.msra.mxu0 %v60_v4 }
  0x17   :  { %71 = vmatpush.msra.mxu0 %v59_v5 }
  0x19   :  { %72 = vmatpush.msra.mxu0 %v58_v6 }
  0x1b   :  { %73 = vmatpush.msra.mxu0 %v57_v7 }
  0x1d   :  { %74 = vmatpush.msra.mxu0 %v56_v8 }
  0x1f   :  { %75 = vmatpush.msra.mxu0 %v55_v9 }
  0x21   :  { %76 = vmatpush.msra.mxu0 %v54_v10 }
  0x23   :  { %77 = vmatpush.msra.mxu0 %v53_v11 }
  0x25   :  { %78 = vmatpush.msra.mxu0 %v52_v12 }
  0x27   :  { %79 = vmatpush.msra.mxu0 %v51_v13 }
  0x29   :  { %80 = vmatpush.msra.mxu0 %v50_v14 }
  0x2b   :  { %81 = vmatpush.msra.mxu0 %v49_v15 }
  0x2c   :  { %82 = vmatmul.f32.vlgmr.msra.gmra.mxu0 %v47_v16 }
  0x34   :  { %85 = vmatmul.f32.gmra.mxu0 %v48_v17 }
  0xa9   :  { %v83_v19 = vpop.f32.mrf.mxu0 }
  0xaa   :  { %v92_v20 = vadd.f32 %v260_v18, %v83_v19 }
  0xac   :  { %111 = vmatpush.xpose.msra.mxu1 %v92_v20  ;;  %203 = vmatpush.msra.mxu3 %v92_v20  ;;  %v94_v21 = vmul.f32 0.17677669, %v92_v20 }
  0xaf   :  { %112 = vmatmul.f32.vlgmr.msra.gmra.mxu1 %v94_v21 }
  0xb1   :  { %v86_v22 = vpop.f32.mrf.mxu0 }
  0xb2   :  { %v93_v23 = vadd.f32 %v260_v18, %v86_v22 }
  0xb4   :  { %131 = vmatpush.xpose.msra.mxu2 %v93_v23  ;;  %226 = vmatpush.msrb.mxu3 %v93_v23  ;;  %v95_v24 = vmul.f32 0.17677669, %v93_v23 }
  0xb7   :  { %132 = vmatmul.f32.vlgmr.msra.gmra.mxu2 %v95_v24 }
 0x12c   :  { %v113_v25 = vpop.f32.mrf.mxu1 }
 0x12d   :  { %v137_v26 = vsel %vm136_vm0, %v113_v25, -inf }
 0x12e   :  { %138 = vmax.xlane.f32.xlu0 %v137_v26 }
 0x13a   :  { %v133_v27 = vpop.f32.mrf.mxu2 }
 0x13b   :  { %v140_v28 = vsel %vm136_vm0, %v133_v27, -inf }
 0x13c   :  { %141 = vmax.xlane.f32.xlu0 %v140_v28 }
 0x1a1   :  { %v139_v29 = vpop.xlane.xlu0 %138 }
 0x1a2   :  { %v143_v30 = vsub.f32 %v113_v25, %v139_v29 }
 0x1a4   :  { %v145_v31 = vmul.f32 1.442695, %v143_v30 }
 0x1a6   :  { %261 = vpow2.f32 %v145_v31 }
 0x1ac   :  { %v262_v32 = vpop.eup %261 }
 0x1ad   :  { %v149_v33 = vsel %vm136_vm0, %v262_v32, 0.0 }
 0x1ae   :  { %150 = vadd.xlane.f32.xlu1 %v149_v33 }
 0x1af   :  { %v142_v34 = vpop.xlane.xlu0 %141 }
 0x1b0   :  { %v144_v35 = vsub.f32 %v133_v27, %v142_v34 }
 0x1b2   :  { %v147_v36 = vmul.f32 1.442695, %v144_v35 }
 0x1b4   :  { %263 = vpow2.f32 %v147_v36 }
 0x1ba   :  { %v264_v37 = vpop.eup %263 }
 0x1bb   :  { %v152_v38 = vsel %vm136_vm0, %v264_v37, 0.0 }
 0x1bc   :  { %153 = vadd.xlane.f32.xlu1 %v152_v38 }
 0x221   :  { %v151_v39 = vpop.xlane.xlu1 %150 }
 0x222   :  { %265 = vrcp.f32 %v151_v39  ;;  %v166_v43 = vand.u32 2147483648, %v151_v39  ;;  %v164_v45 = vand.u32 2147483647, %v151_v39  ;;  %vm160_vm2 = vweird.f32 %v151_v39 }
 0x224   :  { %v167_v48 = vor.u32 1.1754944e-38, %v166_v43  ;;  %vm165_vm4 = vcmp.eq.f32.partialorder %v164_v45, 8.507059e+37 }
 0x228   :  { %v266_v40 = vpop.eup %265 }
 0x229   :  { %v156_v41 = vmul.f32 %v266_v40, %v151_v39  ;;  %vm161_vm1 = vweird.f32 %v266_v40 }
 0x22a   :  { %vm162_vm3 = vmor %vm160_vm2, %vm161_vm1 }
 0x22b   :  { %v157_v42 = vsub.f32 1.0, %v156_v41 }
 0x22d   :  { %v158_v44 = vmul.f32 %v266_v40, %v157_v42 }
 0x22f   :  { %v154_v46 = vpop.xlane.xlu1 %153  ;;  %v159_v47 = vadd.f32 %v266_v40, %v158_v44 }
 0x230   :  { %267 = vrcp.f32 %v154_v46  ;;  %v180_v55 = vand.u32 2147483648, %v154_v46  ;;  %v178_v57 = vand.u32 2147483647, %v154_v46  ;;  %vm174_vm6 = vweird.f32 %v154_v46 }
 0x231   :  { %v163_v49 = vsel %vm162_vm3, %v266_v40, %v159_v47 }
 0x232   :  { %v168_v50 = vsel %vm165_vm4, %v167_v48, %v163_v49  ;;  %v181_v59 = vor.u32 1.1754944e-38, %v180_v55  ;;  %vm179_vm8 = vcmp.eq.f32.partialorder %v178_v57, 8.507059e+37 }
 0x233   :  { %v183_v51 = vmul.f32 %v262_v32, %v168_v50 }
 0x235   :  { %253 = vmatmul.msk.f32.vlgmr.msra.gmra.mxu3 %vm136_vm0, %v183_v51 }
 0x236   :  { %v268_v52 = vpop.eup %267 }
 0x237   :  { %v170_v53 = vmul.f32 %v268_v52, %v154_v46  ;;  %vm175_vm5 = vweird.f32 %v268_v52 }
 0x238   :  { %vm176_vm7 = vmor %vm174_vm6, %vm175_vm5 }
 0x239   :  { %v171_v54 = vsub.f32 1.0, %v170_v53 }
 0x23b   :  { %v172_v56 = vmul.f32 %v268_v52, %v171_v54 }
 0x23d   :  { %v173_v58 = vadd.f32 %v268_v52, %v172_v56 }
 0x23f   :  { %v177_v60 = vsel %vm176_vm7, %v268_v52, %v173_v58 }
 0x240   :  { %v182_v61 = vsel %vm179_vm8, %v181_v59, %v177_v60 }
 0x241   :  { %v184_v62 = vmul.f32 %v264_v37, %v182_v61 }
 0x243   :  { %254 = vmatmul.msk.f32.vlgmr.msrb.gmra.mxu3 %vm136_vm0, %v184_v62 }
 0x2b8   :  { %v205_v63 = vpop.f32.mrf.mxu3 }
 0x2b9   :  { %231 = vst [vmem:[#allocation7] sm:$0xff] %v205_v63 }
 0x2c6   :  { %v228_v0 = vpop.f32.mrf.mxu3 }
 0x2c7   :  { %232 = vst [vmem:[#allocation7 + $0x8] sm:$0xff] %v228_v0 }
 0x2c8   :  { %245 = dma.vmem_to_hbm [thread:$0]  %s238_s24, 256, %s240_s27, [#allocation4], %s348_s20, %s348_s20, %s349_s21  }
 0x2c9   :  { %345 = dma.done.wait [#allocation4], 256  }
 0x2ca   :  { %346 = vsyncadd [#allocation4], 4294967040 }
 0x2cb   :  { %250 = vsyncpa [#allocation3], 1 }
 0x2cc   :  { %251 = vsyncpa [#allocation6], 1 }
 0x2cd   :  { %252 = vsyncpa [#allocation4], 1 }

</bundles_post_ra>
